<compile_context>
chip_gen: v7x
topology: tpu7x:2x2x1
jax: 0.10.0
libtpu: 0.0.40
codegen_flags: <defaults>
</compile_context>

<pallas_src>
import functools

import jax
import jax.numpy as jnp
from jax import lax
from jax.experimental import pallas as pl
from jax.experimental.pallas import tpu as pltpu


# --------------------------------------------------------------------------------------
# pltpu.roll direction handling.  pltpu.roll is documented to match jnp.roll
# (positive shift moves elements toward higher indices); a one-time probe confirms it.
# --------------------------------------------------------------------------------------
_ROLL_SEMANTICS_NUMPY = None   # None -> assume numpy-like (documented behaviour)


def _detect_roll_semantics():
    global _ROLL_SEMANTICS_NUMPY
    if _ROLL_SEMANTICS_NUMPY is not None:
        return _ROLL_SEMANTICS_NUMPY
    x = jnp.arange(8 * 128, dtype=jnp.float32).reshape(8, 128)

    def k(x_ref, o_ref):
        o_ref[...] = pltpu.roll(x_ref[...], 1, axis=1)

    y = pl.pallas_call(k, out_shape=jax.ShapeDtypeStruct((8, 128), jnp.float32))(x)
    _ROLL_SEMANTICS_NUMPY = bool(jnp.array_equal(y, jnp.roll(x, 1, axis=1)))
    return _ROLL_SEMANTICS_NUMPY


def _lane_shift_up(v, d):
    # u[:, i] = v[:, i - d]  (wrap-around lanes are never read by callers)
    np_like = True if _ROLL_SEMANTICS_NUMPY is None else _ROLL_SEMANTICS_NUMPY
    width = v.shape[-1]
    return pltpu.roll(v, d if np_like else width - d, axis=v.ndim - 1)


def _lane_shift_down(v, d):
    # u[:, i] = v[:, i + d]  (wrap-around lanes are never read by callers)
    np_like = True if _ROLL_SEMANTICS_NUMPY is None else _ROLL_SEMANTICS_NUMPY
    width = v.shape[-1]
    return pltpu.roll(v, width - d if np_like else d, axis=v.ndim - 1)


# --------------------------------------------------------------------------------------
# Fused target chain: conv1(603x8)+ReLU -> maxpool(201x4) -> pad -> conv2(303x7)+ReLU
# -> maxpool(101x4).  Data layout (W, H): small W on sublanes, long H on 128-lane axis.
# Conv: rolling accumulator, shifted by one lane per kh tap via pltpu.roll.
# Pool: row max over sublanes, then log-doubling (sparse-table) window max over lanes.
# --------------------------------------------------------------------------------------
def make_target_chain_kernel():
    KH1, KW1 = 603, 8
    KH2, KW2 = 303, 7
    W1P, L1 = 22, 1408            # conv1 padded input rows / lanes (valid lanes 0..1401)
    WO1, HO1 = W1P - KW1 + 1, 800  # conv1 output: (15, 800)  (valid at lanes [602, 1401])
    PKH1, PKW1 = 201, 4
    WP1, HP1 = WO1 - PKW1 + 1, HO1 - PKH1 + 1   # pool1 output: (12, 600)
    L2 = 640                       # conv2 padded lane width (multiple of 128)
    WO2, HO2 = (WP1 + 2) - KW2 + 1, 300          # conv2 output: (8, 300) (valid [302, 601])
    PKH2, PKW2 = 101, 4
    WOUT, HOUT = WO2 - PKW2 + 1, HO2 - PKH2 + 1  # pool2 output: (5, 200)

    def lane_window_max(v, K):
        # u[:, i] = max_{0<=d<K} v[:, i+d]   (log-doubling; wrapped lanes never read)
        P = 1 << (K.bit_length() - 1)
        w = 1
        while w < P:
            v = jnp.maximum(v, _lane_shift_down(v, w))
            w *= 2
        if K > P:
            v = jnp.maximum(v, _lane_shift_down(v, K - P))
        return v

    def conv_lane(slabs, w_ref, KH, KW, n_rows, width, unroll):
        def body(kh, acc):
            acc = _lane_shift_up(acc, 1)
            for kw in range(KW):                       # static unroll over kernel width
                acc = acc + slabs[kw] * w_ref[kh * KW + kw]
            return acc

        return lax.fori_loop(0, KH, body,
                             jnp.zeros((n_rows, width), jnp.float32), unroll=unroll)

    def kernel(x_ref, w1_ref, w2_ref, o_ref):
        # ----- conv1 + ReLU ------------------------------------------------------------
        x = x_ref[0]                                                    # (22, 1408)
        slabs1 = [x[kw:kw + WO1, :] for kw in range(KW1)]               # hoisted (one-time)
        acc1 = conv_lane(slabs1, w1_ref, KH1, KW1, WO1, L1, unroll=9)   # 603 = 9 * 67
        c1 = jnp.maximum(acc1 + w1_ref[KH1 * KW1], 0.0)                 # valid @ lanes [602,1401]
        # ----- maxpool1 (201x4, stride 1) ----------------------------------------------
        m1 = c1[0:WP1, :]
        for kw in range(1, PKW1):
            m1 = jnp.maximum(m1, c1[kw:kw + WP1, :])
        m1 = lane_window_max(m1, PKH1)                                  # pooled @ lanes [602,1201]
        # ----- zero-pad (conv padding=1) for conv2, built in VMEM -----------------------
        x2m = m1[:, KH1 - 2:KH1 - 2 + L2]                               # lanes 601..1240 -> cols 0..639
        lane = lax.broadcasted_iota(jnp.int32, (WP1, L2), 1)
        x2m = jnp.where((lane >= 1) & (lane <= HP1), x2m, 0.0)          # keep cols 1..600
        zrow = jnp.zeros((1, L2), jnp.float32)
        x2 = jnp.concatenate([zrow, x2m, zrow], axis=0)                 # (14, 640)
        # ----- conv2 + ReLU ------------------------------------------------------------
        slabs2 = [x2[kw:kw + WO2, :] for kw in range(KW2)]
        acc2 = conv_lane(slabs2, w2_ref, KH2, KW2, WO2, L2, unroll=3)   # 303 = 3 * 101
        c2 = jnp.maximum(acc2 + w2_ref[KH2 * KW2], 0.0)                 # valid @ lanes [302,601]
        # ----- maxpool2 (101x4, stride 1) ----------------------------------------------
        m2 = c2[0:WOUT, :]
        for kw in range(1, PKW2):
            m2 = jnp.maximum(m2, c2[kw:kw + WOUT, :])
        m2 = lane_window_max(m2, PKH2)                                  # pooled @ lanes [302,501]
        o_ref[0] = m2[:, KH2 - 1:KH2 - 1 + HOUT]                        # (5, 200)

    return kernel


def target_conv_chain_op(x_t, params):
    # x_t: (B, 22, 1408) zero-padded transposed map (conv padding + lane alignment applied)
    B = x_t.shape[0]
    w1 = jnp.concatenate([params["conv1_w"].reshape(-1),
                          params["conv1_b"].reshape(1)]).astype(jnp.float32)
    w2 = jnp.concatenate([params["conv2_w"].reshape(-1),
                          params["conv2_b"].reshape(1)]).astype(jnp.float32)
    return pl.pallas_call(
        make_target_chain_kernel(),
        out_shape=jax.ShapeDtypeStruct((B, 5, 200), jnp.float32),
        grid=(B,),
        in_specs=[
            pl.BlockSpec((1, 22, 1408), lambda i: (i, 0, 0)),
            pl.BlockSpec(memory_space=pltpu.MemorySpace.SMEM),
            pl.BlockSpec(memory_space=pltpu.MemorySpace.SMEM),
        ],
        out_specs=pl.BlockSpec((1, 5, 200), lambda i: (i, 0, 0)),
        compiler_params=pltpu.CompilerParams(dimension_semantics=("parallel",)),
    )(x_t, w1, w2)


# --------------------------------------------------------------------------------------
# Fused target FC chain: fc1+ReLU -> fc2+ReLU -> fc3 (single pallas_call, VMEM resident)
# --------------------------------------------------------------------------------------
def target_fc_kernel(x_ref, w1_ref, b1_ref, w2_ref, b2_ref, w3_ref, b3_ref, o_ref):
    y = jnp.dot(x_ref[...], w1_ref[...], preferred_element_type=jnp.float32) + b1_ref[...]
    y = jnp.maximum(y, 0.0)
    y = jnp.dot(y, w2_ref[...], preferred_element_type=jnp.float32) + b2_ref[...]
    y = jnp.maximum(y, 0.0)
    o_ref[...] = jnp.dot(y, w3_ref[...], preferred_element_type=jnp.float32) + b3_ref[...]


def target_fc_op(x, w1, b1, w2, b2, w3, b3):
    B = x.shape[0]
    N = w3.shape[1]
    vmem = pl.BlockSpec(memory_space=pltpu.MemorySpace.VMEM)
    return pl.pallas_call(
        target_fc_kernel,
        out_shape=jax.ShapeDtypeStruct((B, N), jnp.float32),
        in_specs=[vmem] * 7,
        out_specs=vmem,
    )(x, w1, b1.reshape(1, -1), w2, b2.reshape(1, -1), w3, b3.reshape(1, -1))


# --------------------------------------------------------------------------------------
# Fused head: fc_cpd(+folded BN) -> (implicit concat via split fc1 weights)
# fc1(+BN) -> fc2(+BN) -> fc3(+BN) -> fc4.  BN affines are pre-folded into the weights.
# --------------------------------------------------------------------------------------
def head_kernel(c_ref, t_ref, wc_ref, bc_ref, w1c_ref, w1t_ref, b1_ref,
                w2_ref, b2_ref, w3_ref, b3_ref, w4_ref, b4_ref, o_ref):
    c = jnp.dot(c_ref[...], wc_ref[...], preferred_element_type=jnp.float32) + bc_ref[...]
    r = (jnp.dot(c, w1c_ref[...], preferred_element_type=jnp.float32)
         + jnp.dot(t_ref[...], w1t_ref[...], preferred_element_type=jnp.float32)
         + b1_ref[...])
    r = jnp.dot(r, w2_ref[...], preferred_element_type=jnp.float32) + b2_ref[...]
    r = jnp.dot(r, w3_ref[...], preferred_element_type=jnp.float32) + b3_ref[...]
    o_ref[...] = jnp.dot(r, w4_ref[...], preferred_element_type=jnp.float32) + b4_ref[...]


def head_op(c, t, p):
    B = c.shape[0]
    vmem = pl.BlockSpec(memory_space=pltpu.MemorySpace.VMEM)
    w1 = p["fc1_w"]      # (256, 64): rows 0..127 multiply cpd features, 128..255 target
    inputs = [c, t,
              p["fc_cpd_w"], p["fc_cpd_b"].reshape(1, -1),
              w1[:128], w1[128:], p["fc1_b"].reshape(1, -1),
              p["fc2_w"], p["fc2_b"].reshape(1, -1),
              p["fc3_w"], p["fc3_b"].reshape(1, -1),
              p["fc4_w"], p["fc4_b"].reshape(1, -1)]
    return pl.pallas_call(
        head_kernel,
        out_shape=jax.ShapeDtypeStruct((B, 2), jnp.float32),
        in_specs=[vmem] * len(inputs),
        out_specs=vmem,
    )(*inputs)


# --------------------------------------------------------------------------------------
# Dense GATv2Conv (PyG semantics, edge_attr=None), grid over graphs.
# leaky_relu(z; 0.2) = 0.6*z + 0.4*|z| -> rank-1 linear part hoisted per head.
# Per-head output via narrow (N,N)@(N,C) dots, assembled with one concatenate.
# --------------------------------------------------------------------------------------
def make_gatv2_kernel(N, Fin, H, C, out_act=None, mask_nodes=False):
    HC = H * C

    def kernel(*refs):
        if mask_nodes:
            (x_ref, xt_ref, adj_ref, wl_ref, blr_ref, wlt_ref, blc_ref,
             wr_ref, brr_ref, att_row_ref, att_col_ref, att_s_ref,
             bias_ref, natoms_ref, o_ref) = refs
        else:
            (x_ref, xt_ref, adj_ref, wl_ref, blr_ref, wlt_ref, blc_ref,
             wr_ref, brr_ref, att_row_ref, att_col_ref, att_s_ref,
             bias_ref, o_ref) = refs

        x = x_ref[0]                                                    # (N, Fin)
        xt = xt_ref[0]                                                  # (Fin, N)
        sl = jnp.dot(x, wl_ref[...], preferred_element_type=jnp.float32) + blr_ref[...]      # (N, HC)
        sl_t = jnp.dot(wlt_ref[...], xt, preferred_element_type=jnp.float32) + blc_ref[...]  # (HC, N)
        sr = jnp.dot(x, wr_ref[...], preferred_element_type=jnp.float32) + brr_ref[...]      # (N, HC)
        mbool = adj_ref[0] > 0.5                                        # m[i, j] == edge j -> i
        neg = jnp.float32(-1e30)

        # linear part of leaky_relu (rank-1 per head): 0.6*((att.sr)[i] + (att.sl)[j])
        ucols = sr * att_row_ref[...]                                   # (N, HC)
        vrows = sl_t * att_col_ref[...]                                 # (HC, N)

        head_outs = []
        for h in range(H):
            lo = h * C
            u_col = jnp.sum(ucols[:, lo:lo + C], axis=1, keepdims=True)   # (N, 1)
            v_row = jnp.sum(vrows[lo:lo + C, :], axis=0, keepdims=True)   # (1, N)
            e = 0.6 * (u_col + v_row)
            for c in range(C):                                            # |z| part (nonlinear)
                idx = lo + c
                z = sr[:, idx:idx + 1] + sl_t[idx:idx + 1, :]             # (N, N)
                e = e + att_s_ref[idx] * jnp.abs(z)                       # att_s = 0.4 * att
            e = jnp.where(mbool, e, neg)
            e = e - jnp.max(e, axis=1, keepdims=True)
            ew = jnp.exp(e)
            ew = jnp.where(mbool, ew, 0.0)
            denom = jnp.sum(ew, axis=1, keepdims=True) + 1e-16            # PyG softmax
            alpha = ew * pl.reciprocal(denom, approx=True)
            head_outs.append(jnp.dot(alpha, sl[:, lo:lo + C],
                                     preferred_element_type=jnp.float32))  # (N, C)
        out = head_outs[0] if H == 1 else jnp.concatenate(head_outs, axis=1)
        out = out + bias_ref[...]
        if out_act == "elu":
            out = jnp.where(out > 0.0, out, jnp.exp(out) - 1.0)
        if mask_nodes:
            n = natoms_ref[pl.program_id(0)]
            ids = lax.broadcasted_iota(jnp.int32, (N, 1), 0)
            out = out * (ids < n).astype(jnp.float32)
        o_ref[0] = out                                                    # single full-width store

    return kernel


def gatv2_op(x, mask, gp, out_act=None, num_atoms=None):
    B, N, Fin = x.shape
    H, C = gp["heads"], gp["ch"]
    HC = H * C
    x_t = jnp.swapaxes(x, 1, 2)
    wl, wr, att = gp["wl"], gp["wr"], gp["att"]
    kernel = make_gatv2_kernel(N, Fin, H, C, out_act=out_act,
                               mask_nodes=num_atoms is not None)
    in_specs = [
        pl.BlockSpec((1, N, Fin), lambda b: (b, 0, 0)),
        pl.BlockSpec((1, Fin, N), lambda b: (b, 0, 0)),
        pl.BlockSpec((1, N, N), lambda b: (b, 0, 0)),
        pl.BlockSpec((Fin, HC), lambda b: (0, 0)),
        pl.BlockSpec((1, HC), lambda b: (0, 0)),
        pl.BlockSpec((HC, Fin), lambda b: (0, 0)),
        pl.BlockSpec((HC, 1), lambda b: (0, 0)),
        pl.BlockSpec((Fin, HC), lambda b: (0, 0)),
        pl.BlockSpec((1, HC), lambda b: (0, 0)),
        pl.BlockSpec((1, HC), lambda b: (0, 0)),
        pl.BlockSpec((HC, 1), lambda b: (0, 0)),
        pl.BlockSpec(memory_space=pltpu.MemorySpace.SMEM),      # 0.4*att, flat (HC,)
        pl.BlockSpec((1, HC), lambda b: (0, 0)),
    ]
    inputs = [x, x_t, mask,
              wl, gp["bl"].reshape(1, HC), wl.T, gp["bl"].reshape(HC, 1),
              wr, gp["br"].reshape(1, HC),
              att.reshape(1, HC), att.reshape(HC, 1),
              (0.4 * att).astype(jnp.float32),
              gp["bias"].reshape(1, HC)]
    if num_atoms is not None:
        in_specs.append(pl.BlockSpec(memory_space=pltpu.MemorySpace.SMEM))
        inputs.append(num_atoms.astype(jnp.int32))
    return pl.pallas_call(
        kernel,
        out_shape=jax.ShapeDtypeStruct((B, N, HC), jnp.float32),
        grid=(B,),
        in_specs=in_specs,
        out_specs=pl.BlockSpec((1, N, HC), lambda b: (b, 0, 0)),
        compiler_params=pltpu.CompilerParams(dimension_semantics=("parallel",)),
    )(*inputs)


# --------------------------------------------------------------------------------------
# Parameter init (deterministic, synthetic — no checkpoint).  Eval-mode BatchNorm is
# folded into the adjacent Linear: w' = w*scale, b' = b*scale + shift.
# --------------------------------------------------------------------------------------
def bn_params(key, n):
    k1, k2, k3, k4 = jax.random.split(key, 4)
    gamma = 1.0 + 0.1 * jax.random.normal(k1, (n,), jnp.float32)
    beta = 0.1 * jax.random.normal(k2, (n,), jnp.float32)
    mean = 0.1 * jax.random.normal(k3, (n,), jnp.float32)
    var = 1.0 + 0.1 * jax.random.uniform(k4, (n,), jnp.float32)
    scale = gamma / jnp.sqrt(var + 1e-5)
    shift = beta - mean * scale
    return scale, shift


def fold_bn(w_mat, bias, scale, shift):
    return w_mat * scale[None, :], bias * scale + shift


def init_params(key, dim_in_cpd, dim_h, dim_out, heads):
    keys = iter(jax.random.split(key, 64))

    def w(shape, fan_in):
        return jax.random.normal(next(keys), shape, jnp.float32) / jnp.sqrt(float(fan_in))

    def b(shape):
        return 0.01 * jax.random.normal(next(keys), shape, jnp.float32)

    p = {}
    p["conv1_w"], p["conv1_b"] = w((603, 8), 603 * 8), b(())
    p["conv2_w"], p["conv2_b"] = w((303, 7), 303 * 7), b(())
    # tar_fc1 rows permuted so it consumes the (W, H)-ordered flatten of the lane-dense
    # conv pipeline; equivalent to PyTorch's (H, W) flatten with the raw weight.
    w1 = w((1000, 512), 1000)
    p["tar_fc1_w"] = w1.reshape(200, 5, 512).transpose(1, 0, 2).reshape(1000, 512)
    p["tar_fc1_b"] = b((512,))
    p["tar_fc2_w"], p["tar_fc2_b"] = w((512, 256), 512), b((256,))
    p["tar_fc3_w"], p["tar_fc3_b"] = w((256, 128), 256), b((128,))
    HC1 = heads * dim_h
    p["gat1"] = dict(
        wl=w((dim_in_cpd, HC1), dim_in_cpd), bl=b((HC1,)),
        wr=w((dim_in_cpd, HC1), dim_in_cpd), br=b((HC1,)),
        att=w((HC1,), dim_h), bias=b((HC1,)), heads=heads, ch=dim_h)
    p["gat2"] = dict(
        wl=w((HC1, dim_out), HC1), bl=b((dim_out,)),
        wr=w((HC1, dim_out), HC1), br=b((dim_out,)),
        att=w((dim_out,), dim_out), bias=b((dim_out,)), heads=1, ch=dim_out)
    p["fc_cpd_w"], p["fc_cpd_b"] = fold_bn(
        w((148 * dim_out, 128), 148 * dim_out), b((128,)), *bn_params(next(keys), 128))
    p["fc1_w"], p["fc1_b"] = fold_bn(w((256, 64), 256), b((64,)), *bn_params(next(keys), 64))
    p["fc2_w"], p["fc2_b"] = fold_bn(w((64, 16), 64), b((16,)), *bn_params(next(keys), 16))
    p["fc3_w"], p["fc3_b"] = fold_bn(w((16, 4), 16), b((4,)), *bn_params(next(keys), 4))
    p["fc4_w"], p["fc4_b"] = w((4, 2), 4), b((2,))
    return p


# --------------------------------------------------------------------------------------
# Full forward pass (dropout layers are identity under inference semantics)
# --------------------------------------------------------------------------------------
def phygratt_forward(params, target_input, cpd_x, cpd_mask, num_of_atoms):
    B = target_input.shape[0]

    # [TARGET MODULE] — lane-dense (B, W, H) layout, fully fused conv/pool chain
    t = target_input[:, 0, :, :]                                   # (B, 1400, 20)
    t = jnp.swapaxes(t, 1, 2)                                      # (B, 20, 1400)
    t = jnp.pad(t, ((0, 0), (1, 1), (1, 1408 - 1400 - 1)))         # conv pad + lane align
    t = target_conv_chain_op(t, params)                            # (B, 5, 200)
    t = t.reshape(B, 5 * 200)                                      # (w, h)-ordered flatten
    t = target_fc_op(t, params["tar_fc1_w"], params["tar_fc1_b"],
                     params["tar_fc2_w"], params["tar_fc2_b"],
                     params["tar_fc3_w"], params["tar_fc3_b"])     # (B, 128)

    # [COMPOUND MODULE]
    c = gatv2_op(cpd_x, cpd_mask, params["gat1"], out_act="elu")   # (B, 148, heads*dim_h)
    c = gatv2_op(c, cpd_mask, params["gat2"], out_act=None,
                 num_atoms=num_of_atoms)                           # (B, 148, dim_out), masked
    c = c.reshape(B, -1)                                           # (B, 148*dim_out)

    # [CONCATENATION MODULE] — fused head (concat realized via split fc1 weights, BN folded)
    return head_op(c, t, params)                                   # (B, 2)


# --------------------------------------------------------------------------------------
if __name__ == "__main__":
    _detect_roll_semantics()     # one-time probe of pltpu.roll's shift direction

    B = 2
    dim_in_cpd, dim_h, dim_out, heads = 16, 8, 8, 8
    N_ATOMS = 148
    H_IN, W_IN = 1400, 20        # forced by the conv/pool chain ending at 200*5 features

    root = jax.random.PRNGKey(0)
    k_inp, k_x, k_adj, k_par = jax.random.split(root, 4)

    target_input = jax.random.normal(k_inp, (B, 1, H_IN, W_IN), dtype=jnp.float32)
    cpd_x = jax.random.normal(k_x, (B, N_ATOMS, dim_in_cpd), dtype=jnp.float32)
    num_of_atoms = [97, 123]

    # Dense attention masks M[b, i, j] = 1 iff edge (source j -> target i) after
    # remove_self_loops + add_self_loops, matching PyG GATv2Conv defaults.
    masks = []
    for bidx in range(B):
        kb = jax.random.fold_in(k_adj, bidx)
        a = jax.random.bernoulli(kb, 0.08, (N_ATOMS, N_ATOMS))
        a = jnp.logical_or(a, a.T)                                   # undirected molecular graph
        valid = jnp.arange(N_ATOMS) < num_of_atoms[bidx]
        a = jnp.logical_and(a, valid[:, None] & valid[None, :])      # edges only among real atoms
        eye = jnp.eye(N_ATOMS, dtype=bool)
        a = jnp.logical_and(a, ~eye)                                 # remove_self_loops
        a = jnp.logical_or(a, eye)                                   # add_self_loops
        masks.append(a.T.astype(jnp.float32))                        # M[i, j] = edge j -> i
    cpd_mask = jnp.stack(masks)
    num_atoms_arr = jnp.array(num_of_atoms, dtype=jnp.int32)

    params = init_params(k_par, dim_in_cpd, dim_h, dim_out, heads)

    fwd = jax.jit(functools.partial(phygratt_forward, params))
    out = fwd(target_input, cpd_x, cpd_mask, num_atoms_arr)
    out = jax.block_until_ready(out)
    assert out.shape == (B, 2) and out.dtype == jnp.float32
    print("KERNEL_OK")
</pallas_src>

<mosaic_0001>
module attributes {stable_mosaic.version = 11 : i64} {
  func.func @k(%arg0: memref<8x128xf32, #tpu.memory_space<vmem>>, %arg1: memref<8x128xf32, #tpu.memory_space<vmem>>) attributes {dimension_semantics = [], scalar_prefetch = 0 : i64, scratch_operands = 0 : i64, tpu.core_type = #tpu.core_type<tc>} {
    %c0 = arith.constant 0 : index
    %c0_0 = arith.constant 0 : index
    %0 = vector.load %arg0[%c0, %c0_0] : memref<8x128xf32, #tpu.memory_space<vmem>>, vector<8x128xf32>
    %c1_i32 = arith.constant 1 : i32
    %1 = tpu.dynamic_rotate %0 by %c1_i32 dim 1 : vector<8x128xf32>, i32 -> vector<8x128xf32>
    %c0_1 = arith.constant 0 : index
    %c0_2 = arith.constant 0 : index
    %2 = vector.load %arg1[%c0_1, %c0_2] : memref<8x128xf32, #tpu.memory_space<vmem>>, vector<8x128xf32>
    tpu.vector_store %arg1[%c0_1, %c0_2], %1 {strides = array<i32>} : memref<8x128xf32, #tpu.memory_space<vmem>>, vector<8x128xf32>,
    return
  }
}

</mosaic_0001>

<bundles_post_ra>
// kernel: tpu_custom_call.1
= control target key start
LH: loop header
LB: loop body
LE: loop exit
PB: predicated region body
PF: predicated region fallthrough
CT: control target
= control target key end

     0   :  { %6 = vsyncpa [#allocation3], 0  ;;  %s128_s0 = inlined_call_operand.hbm [shape: f32[8,128], index: 0, kind: input, shape index: {}]   ;;  %s129_s1 = inlined_call_operand.hbm [shape: f32[8,128], index: 1, kind: output, shape index: {}]  }
   0x1   :  { %7 = vsyncpa [#allocation4], 0  ;;  %s91_s6 = smov [#allocation2]   ;;  %s43_s10 = scalar_lea.hbm %s128_s0, 128 }
   0x2   :  { %s14_s7 = sshll.u32 %s91_s6, 4  ;;  %p44_p0 = scmp.ne.s32.totalorder %s128_s0, %s43_s10  ;;  %s15_s7 = int_to_ptr.vmem [resolvable:$true] %s14_s7 }
   0x3   :  { %p47_p1 = scmp.lt.u32.totalorder %s43_s10, %s128_s0 }
   0x5   :  { %p49_p2 = pnand %p47_p1, %p44_p0 }
   0x7   :  { %52 = shalt.err (!%p49_p2)
}
   0x8   :  { %s53_s15 = scalar_lea.vmem %s15_s7, 128  ;;  %p58_p4 = scmp.lt.s32.totalorder %s15_s7, %s15_s7 }
   0x9   :  { %p54_p3 = scmp.ne.s32.totalorder %s15_s7, %s53_s15  ;;  %p59_p5 = scmp.lt.s32.totalorder %s53_s15, %s53_s15 }
   0xb   :  { %p60_p6 = por %p59_p5, %p58_p4 }
   0xd   :  { %p61_p7 = pnand %p60_p6, %p54_p3 }
   0xf   :  { %64 = shalt.err (!%p61_p7)
}
  0x10   :  { %17 = dma.hbm_to_vmem [thread:$0]  %s128_s0, 128, %s15_s7, [#allocation3]  }
  0x11   :  { %87 = dma.done.wait [#allocation3], 128  }
  0x12   :  { %88 = vsyncadd [#allocation3], 4294967168  ;;  %v21_v0 = vld [vmem:[#allocation2] sm:$0xff]  ;;  %s92_s18 = smov 1   ;;  %s93_s19 = smov [#allocation5]  }
  0x13   :  { %22 = vrot.lane.b32.xlu0 %v21_v0, %s92_s18  ;;  %s31_s20 = sshll.u32 %s93_s19, 4  ;;  %s32_s20 = int_to_ptr.vmem [resolvable:$true] %s31_s20 }
  0x14   :  { %s65_s21 = scalar_lea.vmem %s32_s20, 128  ;;  %p70_p9 = scmp.lt.s32.totalorder %s32_s20, %s32_s20 }
  0x15   :  { %p66_p8 = scmp.ne.s32.totalorder %s32_s20, %s65_s21  ;;  %p71_p10 = scmp.lt.s32.totalorder %s65_s21, %s65_s21 }
  0x17   :  { %p72_p11 = por %p71_p10, %p70_p9 }
  0x19   :  { %p73_p12 = pnand %p72_p11, %p66_p8 }
  0x85   :  { %v23_v1 = vpop.permute.xlu0 %22 }
  0x86   :  { %24 = vst [vmem:[#allocation5] sm:$0xff] %v23_v1 }
  0x87   :  { %76 = shalt.err (!%p73_p12)
}
  0x88   :  { %s77_s0 = scalar_lea.hbm %s129_s1, 128 }
  0x89   :  { %p78_p13 = scmp.ne.s32.totalorder %s129_s1, %s77_s0  ;;  %p81_p0 = scmp.lt.u32.totalorder %s77_s0, %s129_s1 }
  0x8b   :  { %p83_p1 = pnand %p81_p0, %p78_p13 }
  0x8d   :  { %86 = shalt.err (!%p83_p1)
}
  0x8e   :  { %34 = dma.vmem_to_hbm [thread:$0]  %s32_s20, 128, %s129_s1, [#allocation4]  }
  0x8f   :  { %89 = dma.done.wait [#allocation4], 128  }
  0x90   :  { %90 = vsyncadd [#allocation4], 4294967168 }
  0x91   :  { %38 = vsyncpa [#allocation3], 1 }
  0x92   :  { %39 = vsyncpa [#allocation4], 1 }

</bundles_post_ra>
